<compile_context>
chip_gen: v7x
topology: tpu7x:2x2x1
jax: 0.10.0
libtpu: 0.0.40
codegen_flags: <defaults>
</compile_context>

<pallas_src>
import math

import jax
import jax.numpy as jnp
from jax.experimental import pallas as pl
from jax.experimental.pallas import tpu as pltpu

NEG_INF = -1e30  # finite "minus infinity": safe under exp() and max() in f32


def make_mha_kernel(scale: float, num_heads: int, kv_block: int):
    def mha_kernel(x_ref, wqkv_ref, wo_ref, bo_ref, o_ref,
                   q_scr, k_scr, v_scr, m_scr, l_scr, acc_scr, ctx_scr):
        Bb, T, d_in = x_ref.shape
        hd = q_scr.shape[-1]
        d_out = o_ref.shape[-1]
        dt = x_ref.dtype

        h = pl.program_id(1)
        kb = pl.program_id(2)
        n_kv = pl.num_programs(2)

        # ---- once per (batch block, head): fused QKV projection + state init ----
        @pl.when(kb == 0)
        def _project():
            x2 = x_ref[...].reshape(Bb * T, d_in)                 # leading-dim merge: free
            qkv = jnp.dot(x2, wqkv_ref[0],
                          preferred_element_type=jnp.float32)     # (Bb*T, 3*hd), N = 3*hd
            q_scr[...] = (qkv[:, :hd] * scale).astype(dt).reshape(Bb, T, hd)
            k_scr[...] = qkv[:, hd:2 * hd].astype(dt).reshape(Bb, T, hd)
            v_scr[...] = qkv[:, 2 * hd:].astype(dt).reshape(Bb, T, hd)
            m_scr[...] = jnp.full_like(m_scr, NEG_INF)
            l_scr[...] = jnp.zeros_like(l_scr)
            acc_scr[...] = jnp.zeros_like(acc_scr)

        # ---- flash / online-softmax step over ONE key block ----
        ks = pl.multiple_of(kb * kv_block, kv_block)
        k_blk = k_scr[:, pl.ds(ks, kv_block), :]                  # (Bb, kv_block, hd)
        v_blk = v_scr[:, pl.ds(ks, kv_block), :]

        s = jnp.einsum('bqd,bkd->bqk', q_scr[...], k_blk,
                       preferred_element_type=jnp.float32)        # (Bb, T, kv_block) f32

        # In-kernel causal mask for this key block (cheap VPU compare/select;
        # no (T, T) mask buffer in VMEM).
        q_idx = jax.lax.broadcasted_iota(jnp.int32, (T, kv_block), 0)
        k_idx = jax.lax.broadcasted_iota(jnp.int32, (T, kv_block), 1) + ks
        s = jnp.where((k_idx <= q_idx)[None, :, :], s, NEG_INF)

        m_prev = m_scr[...]
        m_new = jnp.maximum(m_prev, jnp.max(s, axis=-1, keepdims=True))
        alpha = jnp.exp(m_prev - m_new)
        p = jnp.exp(s - m_new)                                    # unnormalized probs
        l_scr[...] = alpha * l_scr[...] + jnp.sum(p, axis=-1, keepdims=True)
        acc_scr[...] = alpha * acc_scr[...] + jnp.einsum(
            'bqk,bkd->bqd', p.astype(dt), v_blk,
            preferred_element_type=jnp.float32)                   # (Bb, T, hd) f32
        m_scr[...] = m_new

        # ---- per-head finalize: normalize once, stash ctx head-major ----
        @pl.when(kb == n_kv - 1)
        def _head_done():
            ctx = acc_scr[...] * pl.reciprocal(l_scr[...], approx=True)
            ctx_scr[h] = ctx.astype(dt)                           # dynamic leading index

        # ---- last head: single fused output projection (K = d_out) + bias ----
        @pl.when(jnp.logical_and(kb == n_kv - 1, h == pl.num_programs(1) - 1))
        def _finalize():
            ctx_all = jnp.concatenate([ctx_scr[i] for i in range(num_heads)],
                                      axis=-1)                    # (Bb, T, d_out)
            out = jnp.dot(ctx_all.reshape(Bb * T, d_out), wo_ref[...],
                          preferred_element_type=jnp.float32)
            out = out + bo_ref[...].astype(jnp.float32)
            o_ref[...] = out.reshape(Bb, T, d_out).astype(o_ref.dtype)

    return mha_kernel


def multi_head_attention(x, wq, wk, wv, wo, bo, *, num_heads: int,
                         batch_block=None, kv_block=None,
                         vmem_budget_bytes=None):
    """x: (B, T, d_in); wq/wk/wv: (d_in, d_out); wo: (d_out, d_out); bo: (1, d_out)."""
    B, T, d_in = x.shape
    d_out = wq.shape[1]
    assert d_out % num_heads == 0
    head_dim = d_out // num_heads
    itemsize = x.dtype.itemsize

    # ----- VMEM budget (per performance review: ~75% of physical VMEM) -----
    try:
        vmem_cap = int(pltpu.get_tpu_info().vmem_capacity_bytes)
    except Exception:
        vmem_cap = 64 * 1024 * 1024          # conservative (v7x per-TC) fallback
    if vmem_budget_bytes is None:
        vmem_budget_bytes = int(0.75 * vmem_cap)

    def footprint(bb, tk):
        # Pipeline blocks (double-buffered inputs/outputs) + persistent scratch
        # + live f32 temporaries (scores, probs, fused-QKV projection).
        x_blk = 2 * bb * T * d_in * itemsize
        o_blk = 2 * bb * T * d_out * itemsize
        w_blk = 2 * d_in * 3 * head_dim * itemsize + d_out * d_out * itemsize \
            + d_out * itemsize
        qkv_scr = 3 * bb * T * head_dim * itemsize
        ml_scr = 2 * bb * T * 4
        acc_scr = bb * T * head_dim * 4
        ctx_scr = bb * T * d_out * itemsize
        tmp = 2 * bb * T * tk * 4 + bb * T * 3 * head_dim * 4
        return x_blk + o_blk + w_blk + qkv_scr + ml_scr + acc_scr + ctx_scr + tmp

    # ----- key-block size: flash tiling caps the live score tile -----
    if kv_block is None:
        kv_block = T
        for cand in (512, 256, 128):
            if T % cand == 0:
                kv_block = cand
                break
        while kv_block > 128 and kv_block % 2 == 0 and footprint(1, kv_block) > vmem_budget_bytes:
            kv_block //= 2
    assert T % kv_block == 0

    # ----- batch block: largest divisor of B that fits the budget, while
    # keeping >= 2 batch steps so both v7x TensorCores get a "parallel" step ---
    if batch_block is None:
        divisors = [d for d in range(1, B + 1) if B % d == 0]
        cap = B // 2 if B >= 2 else B
        candidates = [d for d in divisors
                      if d <= max(cap, 1) and footprint(d, kv_block) <= vmem_budget_bytes]
        batch_block = max(candidates) if candidates else 1
    assert B % batch_block == 0

    vmem_limit = int(min(max(footprint(batch_block, kv_block) * 1.25,
                             32 * 1024 * 1024),
                         0.9 * vmem_cap))

    # ----- head-major fused QKV weights: (H, d_in, 3*head_dim) -----
    wqkv_h = jnp.concatenate(
        [wq.reshape(d_in, num_heads, head_dim),
         wk.reshape(d_in, num_heads, head_dim),
         wv.reshape(d_in, num_heads, head_dim)], axis=-1).transpose(1, 0, 2)

    kernel = make_mha_kernel(1.0 / math.sqrt(head_dim), num_heads, kv_block)
    grid = (B // batch_block, num_heads, T // kv_block)

    return pl.pallas_call(
        kernel,
        out_shape=jax.ShapeDtypeStruct((B, T, d_out), x.dtype),
        grid_spec=pltpu.PrefetchScalarGridSpec(
            num_scalar_prefetch=0,
            grid=grid,
            in_specs=[
                pl.BlockSpec((batch_block, T, d_in), lambda b, h, kb: (b, 0, 0)),    # x
                pl.BlockSpec((1, d_in, 3 * head_dim), lambda b, h, kb: (h, 0, 0)),   # Wqkv[h]
                pl.BlockSpec((d_out, d_out), lambda b, h, kb: (0, 0)),               # Wo (full)
                pl.BlockSpec((1, d_out), lambda b, h, kb: (0, 0)),                   # b_out
            ],
            out_specs=pl.BlockSpec((batch_block, T, d_out), lambda b, h, kb: (b, 0, 0)),
            scratch_shapes=[
                pltpu.VMEM((batch_block, T, head_dim), x.dtype),           # q (scaled)
                pltpu.VMEM((batch_block, T, head_dim), x.dtype),           # k
                pltpu.VMEM((batch_block, T, head_dim), x.dtype),           # v
                pltpu.VMEM((batch_block, T, 1), jnp.float32),              # m (running max)
                pltpu.VMEM((batch_block, T, 1), jnp.float32),              # l (running sum)
                pltpu.VMEM((batch_block, T, head_dim), jnp.float32),       # ctx accumulator
                pltpu.VMEM((num_heads, batch_block, T, head_dim), x.dtype),  # per-head ctx
            ]),
        compiler_params=pltpu.CompilerParams(
            dimension_semantics=("parallel", "arbitrary", "arbitrary"),
            vmem_limit_bytes=vmem_limit),
    )(x, wqkv_h, wo, bo)


def reference_mha(x, wq, wk, wv, wo, bo, *, num_heads: int):
    """Pure-JAX reference mirroring the PyTorch forward (dropout=0 / eval)."""
    B, T, d_in = x.shape
    d_out = wq.shape[1]
    head_dim = d_out // num_heads
    q = (x @ wq).reshape(B, T, num_heads, head_dim).transpose(0, 2, 1, 3)
    k = (x @ wk).reshape(B, T, num_heads, head_dim).transpose(0, 2, 1, 3)
    v = (x @ wv).reshape(B, T, num_heads, head_dim).transpose(0, 2, 1, 3)
    s = jnp.einsum("bhqd,bhkd->bhqk", q, k) / math.sqrt(head_dim)
    mask = jnp.triu(jnp.ones((T, T), dtype=bool), k=1)
    s = jnp.where(mask[None, None], -jnp.inf, s)
    w = jax.nn.softmax(s, axis=-1)
    ctx = jnp.einsum("bhqk,bhkd->bhqd", w, v).transpose(0, 2, 1, 3).reshape(B, T, d_out)
    return ctx @ wo + bo


if __name__ == "__main__":
    # Small shapes consistent with the module's forward.  kv_block=8 with T=16
    # gives two key blocks, exercising the online-softmax (flash) path.
    B, T, d_in = 2, 16, 32
    d_out, num_heads = 32, 4

    key = jax.random.PRNGKey(0)
    kx, kq, kk, kv, ko, kb = jax.random.split(key, 6)

    x = jax.random.normal(kx, (B, T, d_in), dtype=jnp.float32)
    # Deterministic synthetic parameters (qkv_bias=False; out_proj has bias).
    wq = jax.random.normal(kq, (d_in, d_out), dtype=jnp.float32) * 0.1
    wk = jax.random.normal(kk, (d_in, d_out), dtype=jnp.float32) * 0.1
    wv = jax.random.normal(kv, (d_in, d_out), dtype=jnp.float32) * 0.1
    wo = jax.random.normal(ko, (d_in, d_out), dtype=jnp.float32) * 0.1
    bo = jax.random.normal(kb, (1, d_out), dtype=jnp.float32) * 0.1

    out = multi_head_attention(x, wq, wk, wv, wo, bo, num_heads=num_heads,
                               kv_block=8)
    out = jax.block_until_ready(out)

    ref = reference_mha(x, wq, wk, wv, wo, bo, num_heads=num_heads)
    assert out.shape == (B, T, d_out)
    # Tolerance accounts for the EUP approximate reciprocal used to normalize
    # the softmax (pl.reciprocal(approx=True)).
    assert jnp.allclose(out, ref, atol=2e-3, rtol=2e-3), "mismatch vs reference"

    print("KERNEL_OK")
</pallas_src>

<mosaic_0001>
module attributes {stable_mosaic.version = 11 : i64} {
  func.func @mha_kernel(%arg0: i32, %arg1: i32, %arg2: i32, %arg3: memref<1x16x32xf32, #tpu.memory_space<vmem>>, %arg4: memref<1x32x24xf32, #tpu.memory_space<vmem>>, %arg5: memref<32x32xf32, #tpu.memory_space<vmem>>, %arg6: memref<1x32xf32, #tpu.memory_space<vmem>>, %arg7: memref<1x16x32xf32, #tpu.memory_space<vmem>>, %arg8: memref<1x16x8xf32, #tpu.memory_space<vmem>>, %arg9: memref<1x16x8xf32, #tpu.memory_space<vmem>>, %arg10: memref<1x16x8xf32, #tpu.memory_space<vmem>>, %arg11: memref<1x16x1xf32, #tpu.memory_space<vmem>>, %arg12: memref<1x16x1xf32, #tpu.memory_space<vmem>>, %arg13: memref<1x16x8xf32, #tpu.memory_space<vmem>>, %arg14: memref<4x1x16x8xf32, #tpu.memory_space<vmem>>) attributes {dimension_semantics = [#tpu.dimension_semantics<parallel>, #tpu.dimension_semantics<arbitrary>, #tpu.dimension_semantics<arbitrary>], iteration_bounds = array<i64: 2, 4, 2>, scalar_prefetch = 0 : i64, scratch_operands = 7 : i64, tpu.core_type = #tpu.core_type<tc>, window_params = [{transform_indices = @transform_0, window_bounds = array<i64: 1, 16, 32>}, {transform_indices = @transform_1, window_bounds = array<i64: 1, 32, 24>}, {pipeline_mode = #tpu.pipeline_mode<synchronous>, transform_indices = @transform_2, window_bounds = array<i64: 32, 32>}, {pipeline_mode = #tpu.pipeline_mode<synchronous>, transform_indices = @transform_3, window_bounds = array<i64: 1, 32>}, {transform_indices = @transform_4, window_bounds = array<i64: 1, 16, 32>}]} {
    %c0_i32 = arith.constant 0 : i32
    %0 = arith.cmpi eq, %arg2, %c0_i32 : i32
    %1 = arith.extui %0 : i1 to i32
    %c0_i32_0 = arith.constant 0 : i32
    %2 = arith.cmpi ne, %1, %c0_i32_0 : i32
    scf.if %2 {
      %c0_32 = arith.constant 0 : index
      %c0_33 = arith.constant 0 : index
      %c0_34 = arith.constant 0 : index
      %49 = vector.load %arg3[%c0_32, %c0_33, %c0_34] : memref<1x16x32xf32, #tpu.memory_space<vmem>>, vector<1x16x32xf32>
      %50 = vector.shape_cast %49 : vector<1x16x32xf32> to vector<16x32xf32>
      %c0_35 = arith.constant 0 : index
      %c0_36 = arith.constant 0 : index
      %c0_37 = arith.constant 0 : index
      %51 = vector.load %arg4[%c0_35, %c0_36, %c0_37] : memref<1x32x24xf32, #tpu.memory_space<vmem>>, vector<1x32x24xf32>
      %52 = vector.shape_cast %51 : vector<1x32x24xf32> to vector<32x24xf32>
      %cst_38 = arith.constant dense<0.000000e+00> : vector<16x24xf32>
      %53 = tpu.matmul %50, %52, %cst_38 {dimension_numbers = #tpu.dot_dimension_numbers<[1], [0], [0], [1], [0, 0, 1, 1], [], []>} : vector<16x32xf32>, vector<32x24xf32>, vector<16x24xf32> -> vector<16x24xf32>
      %54 = vector.extract_strided_slice %53 {offsets = [0, 0], sizes = [16, 8], strides = [1, 1]} : vector<16x24xf32> to vector<16x8xf32>
      %cst_39 = arith.constant 0.353553385 : f32
      %55 = vector.broadcast %cst_39 : f32 to vector<16x8xf32>
      %56 = arith.mulf %54, %55 : vector<16x8xf32>
      %57 = vector.shape_cast %56 : vector<16x8xf32> to vector<1x16x8xf32>
      %c0_40 = arith.constant 0 : index
      %c0_41 = arith.constant 0 : index
      %c0_42 = arith.constant 0 : index
      %58 = vector.load %arg8[%c0_40, %c0_41, %c0_42] : memref<1x16x8xf32, #tpu.memory_space<vmem>>, vector<1x16x8xf32>
      tpu.vector_store %arg8[%c0_40, %c0_41, %c0_42], %57 {strides = array<i32>} : memref<1x16x8xf32, #tpu.memory_space<vmem>>, vector<1x16x8xf32>,
      %59 = vector.extract_strided_slice %53 {offsets = [0, 8], sizes = [16, 8], strides = [1, 1]} : vector<16x24xf32> to vector<16x8xf32>
      %60 = vector.shape_cast %59 : vector<16x8xf32> to vector<1x16x8xf32>
      %c0_43 = arith.constant 0 : index
      %c0_44 = arith.constant 0 : index
      %c0_45 = arith.constant 0 : index
      %61 = vector.load %arg9[%c0_43, %c0_44, %c0_45] : memref<1x16x8xf32, #tpu.memory_space<vmem>>, vector<1x16x8xf32>
      tpu.vector_store %arg9[%c0_43, %c0_44, %c0_45], %60 {strides = array<i32>} : memref<1x16x8xf32, #tpu.memory_space<vmem>>, vector<1x16x8xf32>,
      %62 = vector.extract_strided_slice %53 {offsets = [0, 16], sizes = [16, 8], strides = [1, 1]} : vector<16x24xf32> to vector<16x8xf32>
      %63 = vector.shape_cast %62 : vector<16x8xf32> to vector<1x16x8xf32>
      %c0_46 = arith.constant 0 : index
      %c0_47 = arith.constant 0 : index
      %c0_48 = arith.constant 0 : index
      %64 = vector.load %arg10[%c0_46, %c0_47, %c0_48] : memref<1x16x8xf32, #tpu.memory_space<vmem>>, vector<1x16x8xf32>
      tpu.vector_store %arg10[%c0_46, %c0_47, %c0_48], %63 {strides = array<i32>} : memref<1x16x8xf32, #tpu.memory_space<vmem>>, vector<1x16x8xf32>,
      %cst_49 = arith.constant -1.000000e+30 : f32
      %65 = vector.broadcast %cst_49 : f32 to vector<1x16x1xf32>
      %c0_50 = arith.constant 0 : index
      %c0_51 = arith.constant 0 : index
      %c0_52 = arith.constant 0 : index
      %66 = vector.load %arg11[%c0_50, %c0_51, %c0_52] : memref<1x16x1xf32, #tpu.memory_space<vmem>>, vector<1x16x1xf32>
      tpu.vector_store %arg11[%c0_50, %c0_51, %c0_52], %65 {strides = array<i32>} : memref<1x16x1xf32, #tpu.memory_space<vmem>>, vector<1x16x1xf32>,
      %cst_53 = arith.constant 0.000000e+00 : f32
      %67 = vector.broadcast %cst_53 : f32 to vector<1x16x1xf32>
      %c0_54 = arith.constant 0 : index
      %c0_55 = arith.constant 0 : index
      %c0_56 = arith.constant 0 : index
      %68 = vector.load %arg12[%c0_54, %c0_55, %c0_56] : memref<1x16x1xf32, #tpu.memory_space<vmem>>, vector<1x16x1xf32>
      tpu.vector_store %arg12[%c0_54, %c0_55, %c0_56], %67 {strides = array<i32>} : memref<1x16x1xf32, #tpu.memory_space<vmem>>, vector<1x16x1xf32>,
      %cst_57 = arith.constant 0.000000e+00 : f32
      %69 = vector.broadcast %cst_57 : f32 to vector<1x16x8xf32>
      %c0_58 = arith.constant 0 : index
      %c0_59 = arith.constant 0 : index
      %c0_60 = arith.constant 0 : index
      %70 = vector.load %arg13[%c0_58, %c0_59, %c0_60] : memref<1x16x8xf32, #tpu.memory_space<vmem>>, vector<1x16x8xf32>
      tpu.vector_store %arg13[%c0_58, %c0_59, %c0_60], %69 {strides = array<i32>} : memref<1x16x8xf32, #tpu.memory_space<vmem>>, vector<1x16x8xf32>,
    } else {
    }
    %c8_i32 = arith.constant 8 : i32
    %3 = arith.muli %arg2, %c8_i32 : i32
    %4 = tpu.assume_multiple %3, 8 : i32
    %c0 = arith.constant 0 : index
    %5 = arith.index_cast %4 : i32 to index
    %c0_1 = arith.constant 0 : index
    %6 = vector.load %arg9[%c0, %5, %c0_1] : memref<1x16x8xf32, #tpu.memory_space<vmem>>, vector<1x8x8xf32>
    %c0_2 = arith.constant 0 : index
    %7 = arith.index_cast %4 : i32 to index
    %c0_3 = arith.constant 0 : index
    %8 = vector.load %arg10[%c0_2, %7, %c0_3] : memref<1x16x8xf32, #tpu.memory_space<vmem>>, vector<1x8x8xf32>
    %c0_4 = arith.constant 0 : index
    %c0_5 = arith.constant 0 : index
    %c0_6 = arith.constant 0 : index
    %9 = vector.load %arg8[%c0_4, %c0_5, %c0_6] : memref<1x16x8xf32, #tpu.memory_space<vmem>>, vector<1x16x8xf32>
    "tpu.trace_start"() <{level = 10 : i32, message = "bqd,bkd->bqk"}> : () -> ()
    %cst = arith.constant dense<0.000000e+00> : vector<1x16x8xf32>
    %10 = tpu.matmul %9, %6, %cst {dimension_numbers = #tpu.dot_dimension_numbers<[2], [2], [1], [1], [0, 0, 0, 1, 1, 1], [0], [0]>} : vector<1x16x8xf32>, vector<1x8x8xf32>, vector<1x16x8xf32> -> vector<1x16x8xf32>
    "tpu.trace_stop"() : () -> ()
    %11 = tpu.iota {dimensions = array<i32: 0>} : vector<16x8xi32>
    %12 = tpu.iota {dimensions = array<i32: 1>} : vector<16x8xi32>
    %13 = vector.broadcast %4 : i32 to vector<16x8xi32>
    %14 = arith.addi %12, %13 : vector<16x8xi32>
    %15 = arith.cmpi sle, %14, %11 : vector<16x8xi32>
    %16 = vector.shape_cast %15 : vector<16x8xi1> to vector<1x16x8xi1>
    %cst_7 = arith.constant -1.000000e+30 : f32
    %17 = vector.broadcast %cst_7 : f32 to vector<1x16x8xf32>
    %18 = arith.select %16, %10, %17 : vector<1x16x8xi1>, vector<1x16x8xf32>
    %c0_8 = arith.constant 0 : index
    %c0_9 = arith.constant 0 : index
    %c0_10 = arith.constant 0 : index
    %19 = vector.load %arg11[%c0_8, %c0_9, %c0_10] : memref<1x16x1xf32, #tpu.memory_space<vmem>>, vector<1x16x1xf32>
    %cst_11 = arith.constant dense<0xFF800000> : vector<1x16xf32>
    %20 = vector.multi_reduction <maximumf>, %18, %cst_11 [2] : vector<1x16x8xf32> to vector<1x16xf32>
    %21 = vector.shape_cast %20 : vector<1x16xf32> to vector<1x16x1xf32>
    %22 = arith.maximumf %19, %21 : vector<1x16x1xf32>
    %23 = arith.subf %19, %22 : vector<1x16x1xf32>
    %24 = math.exp %23 : vector<1x16x1xf32>
    %25 = vector.broadcast %22 : vector<1x16x1xf32> to vector<1x16x8xf32>
    %26 = arith.subf %18, %25 : vector<1x16x8xf32>
    %27 = math.exp %26 : vector<1x16x8xf32>
    %c0_12 = arith.constant 0 : index
    %c0_13 = arith.constant 0 : index
    %c0_14 = arith.constant 0 : index
    %28 = vector.load %arg12[%c0_12, %c0_13, %c0_14] : memref<1x16x1xf32, #tpu.memory_space<vmem>>, vector<1x16x1xf32>
    %29 = arith.mulf %24, %28 : vector<1x16x1xf32>
    %cst_15 = arith.constant dense<0.000000e+00> : vector<1x16xf32>
    %30 = vector.multi_reduction <add>, %27, %cst_15 [2] : vector<1x16x8xf32> to vector<1x16xf32>
    %31 = vector.shape_cast %30 : vector<1x16xf32> to vector<1x16x1xf32>
    %32 = arith.addf %29, %31 : vector<1x16x1xf32>
    %c0_16 = arith.constant 0 : index
    %c0_17 = arith.constant 0 : index
    %c0_18 = arith.constant 0 : index
    %33 = vector.load %arg12[%c0_16, %c0_17, %c0_18] : memref<1x16x1xf32, #tpu.memory_space<vmem>>, vector<1x16x1xf32>
    tpu.vector_store %arg12[%c0_16, %c0_17, %c0_18], %32 {strides = array<i32>} : memref<1x16x1xf32, #tpu.memory_space<vmem>>, vector<1x16x1xf32>,
    %c0_19 = arith.constant 0 : index
    %c0_20 = arith.constant 0 : index
    %c0_21 = arith.constant 0 : index
    %34 = vector.load %arg13[%c0_19, %c0_20, %c0_21] : memref<1x16x8xf32, #tpu.memory_space<vmem>>, vector<1x16x8xf32>
    %35 = vector.broadcast %24 : vector<1x16x1xf32> to vector<1x16x8xf32>
    %36 = arith.mulf %35, %34 : vector<1x16x8xf32>
    "tpu.trace_start"() <{level = 10 : i32, message = "bqk,bkd->bqd"}> : () -> ()
    %cst_22 = arith.constant dense<0.000000e+00> : vector<1x16x8xf32>
    %37 = tpu.matmul %27, %8, %cst_22 {dimension_numbers = #tpu.dot_dimension_numbers<[2], [1], [1], [2], [0, 0, 0, 1, 1, 2], [0], [0]>} : vector<1x16x8xf32>, vector<1x8x8xf32>, vector<1x16x8xf32> -> vector<1x16x8xf32>
    "tpu.trace_stop"() : () -> ()
    %38 = arith.addf %36, %37 : vector<1x16x8xf32>
    %c0_23 = arith.constant 0 : index
    %c0_24 = arith.constant 0 : index
    %c0_25 = arith.constant 0 : index
    %39 = vector.load %arg13[%c0_23, %c0_24, %c0_25] : memref<1x16x8xf32, #tpu.memory_space<vmem>>, vector<1x16x8xf32>
    tpu.vector_store %arg13[%c0_23, %c0_24, %c0_25], %38 {strides = array<i32>} : memref<1x16x8xf32, #tpu.memory_space<vmem>>, vector<1x16x8xf32>,
    %c0_26 = arith.constant 0 : index
    %c0_27 = arith.constant 0 : index
    %c0_28 = arith.constant 0 : index
    %40 = vector.load %arg11[%c0_26, %c0_27, %c0_28] : memref<1x16x1xf32, #tpu.memory_space<vmem>>, vector<1x16x1xf32>
    tpu.vector_store %arg11[%c0_26, %c0_27, %c0_28], %22 {strides = array<i32>} : memref<1x16x1xf32, #tpu.memory_space<vmem>>, vector<1x16x1xf32>,
    %c1_i32 = arith.constant 1 : i32
    %41 = arith.cmpi eq, %arg2, %c1_i32 : i32
    %42 = arith.extui %41 : i1 to i32
    %c0_i32_29 = arith.constant 0 : i32
    %43 = arith.cmpi ne, %42, %c0_i32_29 : i32
    scf.if %43 {
      %c0_32 = arith.constant 0 : index
      %c0_33 = arith.constant 0 : index
      %c0_34 = arith.constant 0 : index
      %49 = vector.load %arg13[%c0_32, %c0_33, %c0_34] : memref<1x16x8xf32, #tpu.memory_space<vmem>>, vector<1x16x8xf32>
      %c0_35 = arith.constant 0 : index
      %c0_36 = arith.constant 0 : index
      %c0_37 = arith.constant 0 : index
      %50 = vector.load %arg12[%c0_35, %c0_36, %c0_37] : memref<1x16x1xf32, #tpu.memory_space<vmem>>, vector<1x16x1xf32>
      %51 = tpu.reciprocal %50 {approx = true} : vector<1x16x1xf32> -> vector<1x16x1xf32>
      %52 = vector.broadcast %51 : vector<1x16x1xf32> to vector<1x16x8xf32>
      %53 = arith.mulf %49, %52 : vector<1x16x8xf32>
      %54 = arith.index_cast %arg1 : i32 to index
      %c0_38 = arith.constant 0 : index
      %c0_39 = arith.constant 0 : index
      %c0_40 = arith.constant 0 : index
      %55 = vector.load %arg14[%54, %c0_38, %c0_39, %c0_40] : memref<4x1x16x8xf32, #tpu.memory_space<vmem>>, vector<1x1x16x8xf32>
      %56 = vector.shape_cast %55 : vector<1x1x16x8xf32> to vector<1x16x8xf32>
      %57 = vector.shape_cast %53 : vector<1x16x8xf32> to vector<1x1x16x8xf32>
      tpu.vector_store %arg14[%54, %c0_38, %c0_39, %c0_40], %57 {strides = array<i32>} : memref<4x1x16x8xf32, #tpu.memory_space<vmem>>, vector<1x1x16x8xf32>,
    } else {
    }
    %c1_i32_30 = arith.constant 1 : i32
    %44 = arith.cmpi eq, %arg2, %c1_i32_30 : i32
    %c3_i32 = arith.constant 3 : i32
    %45 = arith.cmpi eq, %arg1, %c3_i32 : i32
    %46 = arith.andi %44, %45 : i1
    %47 = arith.extui %46 : i1 to i32
    %c0_i32_31 = arith.constant 0 : i32
    %48 = arith.cmpi ne, %47, %c0_i32_31 : i32
    scf.if %48 {
      %c0_32 = arith.constant 0 : index
      %c0_33 = arith.constant 0 : index
      %c0_34 = arith.constant 0 : index
      %c0_35 = arith.constant 0 : index
      %49 = vector.load %arg14[%c0_32, %c0_33, %c0_34, %c0_35] : memref<4x1x16x8xf32, #tpu.memory_space<vmem>>, vector<1x1x16x8xf32>
      %50 = vector.shape_cast %49 : vector<1x1x16x8xf32> to vector<1x16x8xf32>
      %c1 = arith.constant 1 : index
      %c0_36 = arith.constant 0 : index
      %c0_37 = arith.constant 0 : index
      %c0_38 = arith.constant 0 : index
      %51 = vector.load %arg14[%c1, %c0_36, %c0_37, %c0_38] : memref<4x1x16x8xf32, #tpu.memory_space<vmem>>, vector<1x1x16x8xf32>
      %52 = vector.shape_cast %51 : vector<1x1x16x8xf32> to vector<1x16x8xf32>
      %c2 = arith.constant 2 : index
      %c0_39 = arith.constant 0 : index
      %c0_40 = arith.constant 0 : index
      %c0_41 = arith.constant 0 : index
      %53 = vector.load %arg14[%c2, %c0_39, %c0_40, %c0_41] : memref<4x1x16x8xf32, #tpu.memory_space<vmem>>, vector<1x1x16x8xf32>
      %54 = vector.shape_cast %53 : vector<1x1x16x8xf32> to vector<1x16x8xf32>
      %c3 = arith.constant 3 : index
      %c0_42 = arith.constant 0 : index
      %c0_43 = arith.constant 0 : index
      %c0_44 = arith.constant 0 : index
      %55 = vector.load %arg14[%c3, %c0_42, %c0_43, %c0_44] : memref<4x1x16x8xf32, #tpu.memory_space<vmem>>, vector<1x1x16x8xf32>
      %56 = vector.shape_cast %55 : vector<1x1x16x8xf32> to vector<1x16x8xf32>
      %57 = tpu.concatenate %50, %52, %54, %56 in 2 : vector<1x16x8xf32>, vector<1x16x8xf32>, vector<1x16x8xf32>, vector<1x16x8xf32> -> vector<1x16x32xf32>
      %58 = vector.shape_cast %57 : vector<1x16x32xf32> to vector<16x32xf32>
      %c0_45 = arith.constant 0 : index
      %c0_46 = arith.constant 0 : index
      %59 = vector.load %arg5[%c0_45, %c0_46] : memref<32x32xf32, #tpu.memory_space<vmem>>, vector<32x32xf32>
      %cst_47 = arith.constant dense<0.000000e+00> : vector<16x32xf32>
      %60 = tpu.matmul %58, %59, %cst_47 {dimension_numbers = #tpu.dot_dimension_numbers<[1], [0], [0], [1], [0, 0, 1, 1], [], []>} : vector<16x32xf32>, vector<32x32xf32>, vector<16x32xf32> -> vector<16x32xf32>
      %c0_48 = arith.constant 0 : index
      %c0_49 = arith.constant 0 : index
      %61 = vector.load %arg6[%c0_48, %c0_49] : memref<1x32xf32, #tpu.memory_space<vmem>>, vector<1x32xf32>
      %62 = vector.broadcast %61 : vector<1x32xf32> to vector<16x32xf32>
      %63 = arith.addf %60, %62 : vector<16x32xf32>
      %64 = vector.shape_cast %63 : vector<16x32xf32> to vector<1x16x32xf32>
      %c0_50 = arith.constant 0 : index
      %c0_51 = arith.constant 0 : index
      %c0_52 = arith.constant 0 : index
      %65 = vector.load %arg7[%c0_50, %c0_51, %c0_52] : memref<1x16x32xf32, #tpu.memory_space<vmem>>, vector<1x16x32xf32>
      tpu.vector_store %arg7[%c0_50, %c0_51, %c0_52], %64 {strides = array<i32>} : memref<1x16x32xf32, #tpu.memory_space<vmem>>, vector<1x16x32xf32>,
    } else {
    }
    return
  }
  func.func @transform_0(%arg0: i32, %arg1: i32, %arg2: i32) -> (i32, i32, i32) {
    %c0_i32 = arith.constant 0 : i32
    %c0_i32_0 = arith.constant 0 : i32
    %c0_i32_1 = arith.constant 0 : i32
    return %arg0, %c0_i32, %c0_i32_0 : i32, i32, i32
  }
  func.func @transform_1(%arg0: i32, %arg1: i32, %arg2: i32) -> (i32, i32, i32) {
    %c0_i32 = arith.constant 0 : i32
    %c0_i32_0 = arith.constant 0 : i32
    %c0_i32_1 = arith.constant 0 : i32
    return %arg1, %c0_i32, %c0_i32_0 : i32, i32, i32
  }
  func.func @transform_2(%arg0: i32, %arg1: i32, %arg2: i32) -> (i32, i32) {
    %c0_i32 = arith.constant 0 : i32
    %c0_i32_0 = arith.constant 0 : i32
    %c0_i32_1 = arith.constant 0 : i32
    return %c0_i32, %c0_i32_0 : i32, i32
  }
  func.func @transform_3(%arg0: i32, %arg1: i32, %arg2: i32) -> (i32, i32) {
    %c0_i32 = arith.constant 0 : i32
    %c0_i32_0 = arith.constant 0 : i32
    %c0_i32_1 = arith.constant 0 : i32
    return %c0_i32, %c0_i32_0 : i32, i32
  }
  func.func @transform_4(%arg0: i32, %arg1: i32, %arg2: i32) -> (i32, i32, i32) {
    %c0_i32 = arith.constant 0 : i32
    %c0_i32_0 = arith.constant 0 : i32
    %c0_i32_1 = arith.constant 0 : i32
    return %arg0, %c0_i32, %c0_i32_0 : i32, i32, i32
  }
}

</mosaic_0001>

<bundles_post_ra>
// kernel: tpu_custom_call.1
= control target key start
LH: loop header
LB: loop body
LE: loop exit
PB: predicated region body
PF: predicated region fallthrough
CT: control target
= control target key end

     0   :  { %9 = vsyncpa [#allocation10], 0  ;;  %s1473_s0 = inlined_call_operand.vmem [shape: f32[2,16,32], index: 0, kind: input, shape index: {}]   ;;  %s1474_s1 = inlined_call_operand.vmem [shape: f32[4,32,24], index: 1, kind: input, shape index: {}]   ;;  %s1475_s2 = inlined_call_operand.vmem [shape: f32[32,32], index: 2, kind: input, shape index: {}]   ;;  %s1476_s3 = inlined_call_operand.vmem [shape: f32[1,32], index: 3, kind: input, shape index: {}]   ;;  %s1477_s4 = inlined_call_operand.hbm [shape: f32[2,16,32], index: 4, kind: output, shape index: {}]  }
   0x1   :  { %11 = vsyncpa [#allocation10 + $0x1], 0  ;;  %s1248_s15 = smov 0   ;;  %s1250_s16 = smov 0  }
   0x2   :  { %s1252_s17 = smov 0   ;;  %s1254_s18 = smov 0  }
   0x3   :  { %s1256_s19 = smov 0   ;;  %s1258_s20 = smov 0  }
   0x4   :  { %s1260_s21 = smov 0   ;;  %s1262_s22 = smov 0  }
   0x5   :  { %s1264_s23 = smov 0   ;;  %s1266_s24 = smov 0  }
   0x6 LB: > { %s888_s25 = sadd.s32 4294967295, %s1209_s24   ;;  %s889_s26 = sadd.s32 4294967294, %s1209_s24   ;;  %s1209_s24 = sphi %s1266_s24, %s17_s24   ;;  %s1205_s23 = sphi %s1264_s23, %s1495_s23   ;;  %s1201_s22 = sphi %s1262_s22, %s1494_s22   ;;  %s1197_s21 = sphi %s1260_s21, %s1493_s21   ;;  %s1193_s20 = sphi %s1258_s20, %s1492_s20   ;;  %s1189_s19 = sphi %s1256_s19, %s1491_s19   ;;  %s1185_s18 = sphi %s1254_s18, %s1490_s18   ;;  %s1181_s17 = sphi %s1252_s17, %s1489_s17   ;;  %s1177_s16 = sphi %s1250_s16, %s1488_s16   ;;  %s1173_s15 = sphi %s1248_s15, %s1487_s15  }
   0x7   : > { %s29_s27 = sadd.s32 1, %s1197_s21  ;;  %s32_s28 = sadd.s32 1, %s1201_s22 }
   0x8   : > { %p30_p0 = scmp.ge.s32.totalorder %s29_s27, 2  ;;  %s36_s29 = sadd.s32 1, %s1205_s23 }
   0x9   : > { %p147_p1 = scmp.ne.s32.totalorder %s1181_s17, %s1177_s16  ;;  %p148_p2 = scmp.eq.s32.totalorder %s888_s25, 15 }
   0xa   : > { %s1497_s27 = smov (%p30_p0, %s29_s27), 0  ;;  %s1499_s28 = smov (!%p30_p0, %s32_s28), %s1201_s22 }
   0xb   : > { %1479 = sst [smem:[#allocation12_spill]] %s1497_s27  ;;  %p153_p3 = scmp.ne.s32.totalorder %s1177_s16, %s1173_s15 }
   0xc   : > { %p34_p4 = scmp.ge.s32.totalorder %s1499_s28, 4  ;;  %p154_p5 = scmp.eq.s32.totalorder %s889_s26, 15 }
   0xd   : > { %p1310_p6 = por %p148_p2, %p147_p1  ;;  %p892_p7 = scmp.ge.s32.totalorder %s1209_s24, 1 }
   0xe   : > { %s1501_s28 = smov (%p34_p4, %s1499_s28), 0  ;;  %s1503_s29 = smov (!%p34_p4, %s36_s29), %s1205_s23 }
   0xf   : > { %1481 = sst [smem:[#allocation13_spill]] %s1501_s28  ;;  %p1318_p8 = por %p154_p5, %p153_p3 }
  0x10   : > { %p194_p9 = scmp.lt.s32.totalorder %s1209_s24, 17  ;;  %p38_p10 = scmp.ge.s32.totalorder %s1503_s29, 2 }
  0x11   : > { %s137_s7 = sadd.s32 1, %s1181_s17 }
  0x12   : > { %p195_p11 = pnand %p892_p7, %p194_p9  ;;  %s1505_s29 = smov (%p38_p10, %s1503_s29), 0 }
  0x13   : > { %1483 = sst [smem:[#allocation14_spill]] %s1505_s29  ;;  %s134_s6 = ssub.s32 %s1205_s23, %s1505_s29 }
  0x14   : > { %p135_p12 = scmp.eq.s32.totalorder %s134_s6, 0  ;;  %198 = sbr.rel (%p195_p11) target bundleno = 1561 (0x619), region = 36 }
  0x15   : > { %s222_s9 = sand.u32 (!%p195_p11), 1, %s1177_s16   ;;  %p225_p13 = scmp.lt.s32.totalorder (!%p195_p11), %s1193_s20, 1 }
  0x16   : > { %s1329_s8 = scalar_select %p135_p12, %s1181_s17, %s137_s7  }
  0x17   : > { %s893_s10 = sshll.u32 (!%p195_p11), %s222_s9, 4  ;;  %p230_p0 = scmp.lt.s32.totalorder (!%p195_p11), %s1189_s19, 3 }
  0x18   : > { %s1344_s27 = scalar_lea.vmem (!%p195_p11), [#allocation9], %s893_s10  ;;  %p898_p1 = scmp.ne.s32.totalorder (!%p195_p11), %s1185_s18, 0 }
  0x1b   : > { %s226_s11 = scalar_select %p225_p13, %s1193_s20, 1 }
  0x1c   : > { %s231_s12 = scalar_select %p230_p0, %s1189_s19, 3 }
  0x1d   : > { %s917_s13 = sshll.u32 %s226_s11, 4  ;;  %238 = sbr.rel (%p898_p1) target bundleno = 376 (0x178), region = 40  ;;  %vm245_vm0 = vcmask (!%p898_p1), 261120   ;;  %vm329_vm1 = vcmask (!%p898_p1), 64512   ;;  %vm350_vm2 = vcmask (!%p898_p1), 7168   ;;  %v1212_v9 = vmov (!%p898_p1), 0.0  }
  0x1e   : > { %s229_s26 = scalar_lea.vmem %s1473_s0, %s917_s13  ;;  %s918_s6 = sshll.u32 %s231_s12, 5  ;;  %v1211_v8 = vmov (!%p898_p1), -1e+30   ;;  %353 = vst.msk [vmem:[#allocation6] sm:$0xff] (!%p898_p1), %vm350_vm2, %v1212_v9  ;;  %354 = vst.msk [vmem:[#allocation6 + $0x8] sm:$0xff] (!%p898_p1), %vm350_vm2, %v1212_v9 }
  0x1f   : > { %s234_s28 = scalar_lea.vmem %s1474_s1, %s918_s6  ;;  %v239_v5 = vld [vmem:[%s229_s26] sm:$0xff] (!%p898_p1)  ;;  %v240_v7 = vld [vmem:[%s229_s26 + $0x8] sm:$0xff] (!%p898_p1)  ;;  %351 = vst.msk [vmem:[#allocation5] sm:$0xff] (!%p898_p1), %vm350_vm2, %v1211_v8  ;;  %352 = vst.msk [vmem:[#allocation5 + $0x8] sm:$0xff] (!%p898_p1), %vm350_vm2, %v1211_v8  ;;  %s1214_s29 = smov (!%p898_p1), 120  }
  0x20   : > { %v241_v0 = vld [vmem:[%s234_s28] sm:$0xff] (!%p898_p1)  ;;  %v242_v1 = vld [vmem:[%s234_s28 + $0x8] sm:$0xff] (!%p898_p1)  ;;  %v243_v2 = vld [vmem:[%s234_s28 + $0x10] sm:$0xff] (!%p898_p1)  ;;  %946 = vmatprep.mubr.msk.f32.mxu0 (!%p898_p1), %vm245_vm0, %v239_v5  ;;  %355 = vst.msk [vmem:[#allocation7] sm:$0xff] (!%p898_p1), %vm329_vm1, %v1212_v9 }
  0x21   : > { %v970_v3 = vpack.c.bf16 (!%p898_p1), %v242_v1, %v241_v0  ;;  %v244_v4 = vld [vmem:[%s234_s28 + $0x18] sm:$0xff] (!%p898_p1)  ;;  %356 = vst.msk [vmem:[#allocation7 + $0x8] sm:$0xff] (!%p898_p1), %vm329_vm1, %v1212_v9  ;;  %s1213_s28 = smov (!%p898_p1), 112  }
  0x22   : > { %v974_v6 = vpack.c.bf16 (!%p898_p1), %v244_v4, %v243_v2 }
  0x23   : > { %971 = vmatprep.subr.bf16.mxu0 (!%p898_p1), %v970_v3 }
  0x24   : > { %973 = vmatpush3.bf16.msra.mxu0 %v970_v3 }
  0x25   : > { %975 = vmatprep.subr.bf16.mxu0 %v974_v6 }
  0x28   : > { %977 = vmatpush3.bf16.msra.mxu0 %v974_v6 }
  0x2b   : > { %947 = vmatmul.mubr.msk.f32.vlgmr.msra.gmra.mrb[0].mxu0 %vm245_vm0, %v240_v7 }
  0xfe   : > { %v948_v10 = vpop.f32.mrb[0].mxu0 }
  0xff   : > { %v328_v11 = vmul.f32 0.35355338, %v948_v10  ;;  %v318_v12 = vpop.f32.mrb[1].mxu0 }
 0x100   : > { %v327_v13 = vmul.f32 0.35355338, %v318_v12  ;;  %342 = vrot.lane.b32.xlu1 %v318_v12, %s1213_s28  ;;  %334 = vrot.lane.b32.xlu0 %v318_v12, %s1214_s29 }
 0x101   : > { %331 = vst.msk [vmem:[#allocation2 + $0x8] sm:$0xff] %vm329_vm1, %v328_v11 }
 0x102   : > { %330 = vst.msk [vmem:[#allocation2] sm:$0xff] %vm329_vm1, %v327_v13 }
 0x104   : > { %344 = vrot.lane.b32.xlu1 %v948_v10, %s1213_s28  ;;  %336 = vrot.lane.b32.xlu0 %v948_v10, %s1214_s29 }
 0x172   : > { %v343_v14 = vpop.permute.xlu1 %342  ;;  %v335_v15 = vpop.permute.xlu0 %334 }
 0x173   : > { %348 = vst.msk [vmem:[#allocation4] sm:$0xff] %vm329_vm1, %v343_v14  ;;  %340 = vst.msk [vmem:[#allocation3] sm:$0xff] %vm329_vm1, %v335_v15 }
 0x176   : > { %v345_v16 = vpop.permute.xlu1 %344  ;;  %v337_v17 = vpop.permute.xlu0 %336 }
 0x177   : > { %349 = vst.msk [vmem:[#allocation4 + $0x8] sm:$0xff] %vm329_vm1, %v345_v16  ;;  %341 = vst.msk [vmem:[#allocation3 + $0x8] sm:$0xff] %vm329_vm1, %v337_v17 }
 0x178 PF: > { %s1356_s10 = sshll.u32 %s1185_s18, 3  ;;  %vm364_vm3 = vcmask 64512   ;;  %v362_v18 = vld [vmem:[#allocation2] sm:$0xff]  ;;  %v363_v20 = vld [vmem:[#allocation2 + $0x8] sm:$0xff]  ;;  %v449_v21 = vlaneseq  ;;  %v1215_v33 = vmov 0   ;;  %vm504_vm6 = vcmask 7168  }
 0x179   : > { %951 = vmatprep.mubr.msk.f32.mxu0 %vm364_vm3, %v362_v18  ;;  %s358_s11 = scalar_lea.vmem [#allocation3], %s1356_s10  ;;  %v454_v23 = vstv %s1356_s10  ;;  %1084 = vset.pattern.permute.xlu1 %v1215_v33  ;;  %s360_s12 = scalar_lea.vmem [#allocation4], %s1356_s10  ;;  %v492_v57 = vld [vmem:[#allocation6] sm:$0xff]  ;;  %v493_v60 = vld [vmem:[#allocation6 + $0x8] sm:$0xff] }
 0x17a   : > { %v453_v22 = vand.u32 127, %v449_v21  ;;  %v450_v24 = vshrl.u32 %v449_v21, 7  ;;  %1085 = vset.pattern.permute.xlu0 %v1215_v33  ;;  %v460_v34 = vld [vmem:[#allocation5] sm:$0xff]  ;;  %v461_v37 = vld [vmem:[#allocation5 + $0x8] sm:$0xff]  ;;  %p608_p2 = scmp.eq.s32.totalorder %s1185_s18, 1  ;;  %p907_p3 = scmp.ne.s32.totalorder %s1185_s18, 1 }
 0x17b   : > { %v507_v3 = vld [vmem:[#allocation7] sm:$0xff]  ;;  %v1216_v13 = vmov (!%p907_p3), 0   ;;  %s908_s13 = sshll.u32 (!%p907_p3), %s1189_s19, 4 }
 0x17c   : > { %v455_v25 = vadd.s32 %v454_v23, %v453_v22  ;;  %v451_v26 = vadd.s32 8, %v450_v24  ;;  %v508_v1 = vld [vmem:[#allocation7 + $0x8] sm:$0xff]  ;;  %s631_s14 = scalar_lea.vmem (!%p907_p3), [#allocation8], %s908_s13 }
 0x17e   : > { %v359_v19 = vld [vmem:[%s358_s11] sm:$0xff]  ;;  %vm456_vm4 = vcmp.le.s32.totalorder %v455_v25, %v450_v24  ;;  %vm457_vm5 = vcmp.le.s32.totalorder %v455_v25, %v451_v26 }
 0x17f   : > { %949 = vmatprep.subr.msk.mxu0 %vm364_vm3, %v359_v19  ;;  %v361_v42 = vld [vmem:[%s360_s12] sm:$0xff] }
 0x180   : > { %950 = vmatpush3.xpose.msk.msra.mxu0 %vm364_vm3, %v359_v19  ;;  %954 = vmatprep.subr.mxu1 %v361_v42 }
 0x181   : > { %955 = vmatpush3.msra.mxu1 %v361_v42 }
 0x183   : > { %952 = vmatmul.mubr.msk.f32.vlgmr.msra.gmra.mrb[0].mxu0 %vm364_vm3, %v363_v20 }
 0x256   : > { %v953_v27 = vpop.f32.mrb[0].mxu0 }
 0x257   : > { %v440_v28 = vpop.f32.mrb[1].mxu0  ;;  %v459_v31 = vsel %vm457_vm5, %v953_v27, -1e+30 }
 0x258   : > { %v458_v29 = vsel %vm456_vm4, %v440_v28, -1e+30  ;;  %v465_v32 = vsel %vm364_vm3, %v459_v31, -inf }
 0x259   : > { %v462_v30 = vsel %vm364_vm3, %v458_v29, -inf }
 0x25a   : > { %463 = vmax.xlane.f32.xlu0 %v462_v30 }
 0x25e   : > { %466 = vmax.xlane.f32.xlu0 %v465_v32 }
 0x2e7   : > { %v464_v35 = vpop.xlane.xlu0 %463 }
 0x2e8   : > { %v468_v36 = vmax.f32 %v460_v34, %v464_v35 }
 0x2ea   : > { %v470_v38 = vsub.f32 %v460_v34, %v468_v36  ;;  %606 = vst.msk [vmem:[#allocation5] sm:$0xff] %vm504_vm6, %v468_v36  ;;  %478 = vperm.xlu1 %1084, %v468_v36  }
 0x2eb   : > { %v467_v39 = vpop.xlane.xlu0 %466 }
 0x2ec   : > { %v469_v40 = vmax.f32 %v461_v37, %v467_v39  ;;  %v472_v54 = vmul.f32 1.442695, %v470_v38 }
 0x2ee   : > { %v471_v41 = vsub.f32 %v461_v37, %v469_v40  ;;  %607 = vst.msk [vmem:[#allocation5 + $0x8] sm:$0xff] %vm504_vm6, %v469_v40  ;;  %483 = vperm.xlu1 %1084, %v469_v40  }
 0x2f0   : > { %v474_v53 = vmul.f32 1.442695, %v471_v41 }
 0x369   : > { %v479_v43 = vpop.permute.xlu1 %478 }
 0x36a   : > { %v486_v44 = vsub.f32 %v458_v29, %v479_v43 }
 0x36c   : > { %v488_v45 = vmul.f32 1.442695, %v486_v44 }
 0x36d   : > { %v484_v46 = vpop.permute.xlu1 %483 }
 0x36e   : > { %1086 = vpow2.f32 %v488_v45  ;;  %v487_v47 = vsub.f32 %v459_v31, %v484_v46 }
 0x370   : > { %v490_v48 = vmul.f32 1.442695, %v487_v47 }
 0x372   : > { %1088 = vpow2.f32 %v490_v48 }
 0x373   : > { %1090 = vpow2.f32 %v474_v53 }
 0x374   : > { %1092 = vpow2.f32 %v472_v54 }
 0x378   : > { %v1087_v49 = vpop.eup %1086 }
 0x379   : > { %956 = vmatprep.mubr.msk.f32.mxu1 %vm364_vm3, %v1087_v49  ;;  %v496_v50 = vsel %vm364_vm3, %v1087_v49, 0.0 }
 0x37a   : > { %497 = vadd.xlane.f32.xlu0 %v496_v50 }
 0x37c   : > { %v1089_v51 = vpop.eup %1088 }
 0x37d   : > { %957 = vmatmul.mubr.msk.f32.vlgmr.msra.gmra.mrb[0].mxu1 %vm364_vm3, %v1089_v51  ;;  %v499_v52 = vsel %vm364_vm3, %v1089_v51, 0.0  ;;  %v1091_v55 = vpop.eup %1090 }
 0x37e   : > { %500 = vadd.xlane.f32.xlu1 %v499_v52  ;;  %v1093_v56 = vpop.eup %1092  ;;  %v495_v62 = vmul.f32 %v1091_v55, %v493_v60 }
 0x37f   : > { %v494_v58 = vmul.f32 %v1093_v56, %v492_v57 }
 0x38f   : > { %516 = vperm.xlu1 %1084, %v1091_v55  }
 0x390   : > { %511 = vperm.xlu0 %1085, %v1093_v56  }
 0x394   : > { %1094 = vset.pattern.permute.xlu0 (!%p907_p3), %v1216_v13 }
 0x407   : > { %v498_v59 = vpop.xlane.xlu0 %497 }
 0x408   : > { %v502_v61 = vadd.f32 %v498_v59, %v494_v58 }
 0x40a   : > { %505 = vst.msk [vmem:[#allocation6] sm:$0xff] %vm504_vm6, %v502_v61 }
 0x40b   : > { %v501_v63 = vpop.xlane.xlu1 %500 }
 0x40c   : > { %v503_v0 = vadd.f32 %v501_v63, %v495_v62 }
 0x40e   : > { %506 = vst.msk [vmem:[#allocation6 + $0x8] sm:$0xff] %vm504_vm6, %v503_v0 }
 0x40f   : > { %v517_v2 = vpop.permute.xlu1 %516  ;;  %v512_v4 = vpop.permute.xlu0 %511 }
 0x410   : > { %v520_v5 = vmul.f32 %v517_v2, %v508_v1  ;;  %v519_v6 = vmul.f32 %v512_v4, %v507_v3 }
 0x411   : > { %v614_v11 = vld [vmem:[#allocation6] sm:$0xff] (!%p907_p3) }
 0x412   : > { %1095 = vrcp.f32 (!%p907_p3), %v614_v11 }
 0x415   : > { %v615_v12 = vld [vmem:[#allocation6 + $0x8] sm:$0xff] (!%p907_p3) }
 0x416   : > { %1097 = vrcp.f32 (!%p907_p3), %v615_v12 }
 0x41c   : > { %v1096_v14 = vpop.eup (!%p907_p3), %1095 }
 0x41d   : > { %620 = vperm.xlu0 (!%p907_p3), %1094, %v1096_v14  }
 0x420   : > { %v1098_v15 = vpop.eup (!%p907_p3), %1097 }
 0x421   : > { %625 = vperm.xlu0 (!%p907_p3), %1094, %v1098_v15  }
 0x44e   : > { %611 = sbr.rel (%p907_p3) target bundleno = 1188 (0x4a4), region = 44 }
 0x450   : > { %v958_v7 = vpop.f32.mrb[0].mxu1 }
 0x451   : > { %v603_v8 = vadd.f32 %v958_v7, %v520_v5  ;;  %v593_v9 = vpop.f32.mrb[1].mxu1 }
 0x452   : > { %v602_v10 = vadd.f32 %v593_v9, %v519_v6 }
 0x453   : > { %605 = vst.msk [vmem:[#allocation7 + $0x8] sm:$0xff] %vm364_vm3, %v603_v8 }
 0x454   : > { %604 = vst.msk [vmem:[#allocation7] sm:$0xff] %vm364_vm3, %v602_v10 }
 0x45a   : > { %v613_v19 = vld [vmem:[#allocation7 + $0x8] sm:$0xff] }
 0x45b   : > { %v612_v16 = vld [vmem:[#allocation7] sm:$0xff] }
 0x49c   : > { %v621_v17 = vpop.permute.xlu0 %620 }
 0x49d   : > { %v628_v18 = vmul.f32 %v621_v17, %v612_v16 }
 0x49f   : > { %632 = vst.msk [vmem:[%s631_s14] sm:$0xff] %vm364_vm3, %v628_v18 }
 0x4a0   : > { %v626_v20 = vpop.permute.xlu0 %625 }
 0x4a1   : > { %v629_v21 = vmul.f32 %v626_v20, %v613_v19 }
 0x4a3   : > { %633 = vst.msk [vmem:[%s631_s14 + $0x8] sm:$0xff] %vm364_vm3, %v629_v21 }
 0x4a4 PF: > { %p634_p4 = scmp.eq.s32.totalorder %s1189_s19, 3 }
 0x4a6   : > { %p635_p5 = pnand %p634_p4, %p608_p2 }
 0x4a7   : > { %s1217_s25 = smov (!%p635_p5), 16   ;;  %s1218_s26 = smov (!%p635_p5), 8   ;;  %v682_v26 = vld [vmem:[%s1475_s2] sm:$0xff] (!%p635_p5)  ;;  %v683_v27 = vld [vmem:[%s1475_s2 + $0x8] sm:$0xff] (!%p635_p5)  ;;  %v684_v29 = vld [vmem:[%s1475_s2 + $0x10] sm:$0xff] (!%p635_p5)  ;;  %vm676_vm7 = vcmask (!%p635_p5), 130048  }
 0x4a8   : > { %638 = sbr.rel (%p635_p5) target bundleno = 1536 (0x600), region = 48  ;;  %v978_v28 = vpack.c.bf16 (!%p635_p5), %v683_v27, %v682_v26  ;;  %v685_v30 = vld [vmem:[%s1475_s2 + $0x18] sm:$0xff] (!%p635_p5)  ;;  %s1219_s12 = smov (!%p635_p5), 24   ;;  %vm679_vm8 = vcmask (!%p635_p5), 195584   ;;  %vm693_vm9 = vcmask (!%p635_p5), 261120  }
 0x4a9   : > { %v982_v31 = vpack.c.bf16 (!%p635_p5), %v685_v30, %v684_v29  ;;  %v909_v48 = vld [vmem:[%s1476_s3] ss:$0 sm:$0xff] (!%p635_p5) }
 0x4aa   : > { %v645_v22 = vld [vmem:[#allocation8 + $0x20] sm:$0xff] (!%p635_p5)  ;;  %v642_v23 = vld [vmem:[#allocation8 + $0x10] sm:$0xff] (!%p635_p5)  ;;  %v646_v24 = vld [vmem:[#allocation8 + $0x28] sm:$0xff] (!%p635_p5)  ;;  %979 = vmatprep.subr.bf16.mxu0 (!%p635_p5), %v978_v28 }
 0x4ab   : > { %660 = vrot.lane.b32.xlu1 (!%p635_p5), %v645_v22, %s1217_s25  ;;  %652 = vrot.lane.b32.xlu0 (!%p635_p5), %v642_v23, %s1218_s26  ;;  %v643_v25 = vld [vmem:[#allocation8 + $0x18] sm:$0xff] (!%p635_p5)  ;;  %v648_v33 = vld [vmem:[#allocation8 + $0x30] sm:$0xff] (!%p635_p5)  ;;  %v639_v36 = vld [vmem:[#allocation8] sm:$0xff] (!%p635_p5) }
 0x4ac   : > { %v649_v32 = vld [vmem:[#allocation8 + $0x38] sm:$0xff] (!%p635_p5)  ;;  %981 = vmatpush3.bf16.msra.mxu0 (!%p635_p5), %v978_v28  ;;  %v640_v37 = vld [vmem:[#allocation8 + $0x8] sm:$0xff] (!%p635_p5) }
 0x4ad   : > { %983 = vmatprep.subr.bf16.mxu0 (!%p635_p5), %v982_v31 }
 0x4af   : > { %662 = vrot.lane.b32.xlu1 %v646_v24, %s1217_s25  ;;  %654 = vrot.lane.b32.xlu0 %v643_v25, %s1218_s26 }
 0x4b0   : > { %985 = vmatpush3.bf16.msra.mxu0 %v982_v31 }
 0x4b3   : > { %670 = vrot.lane.b32.xlu1 %v649_v32, %s1219_s12  ;;  %668 = vrot.lane.b32.xlu0 %v648_v33, %s1219_s12 }
 0x51d   : > { %v661_v34 = vpop.permute.xlu1 %660  ;;  %v653_v35 = vpop.permute.xlu0 %652 }
 0x51e   : > { %v674_v40 = vsel %vm364_vm3, %v639_v36, %v653_v35 }
 0x51f   : > { %v677_v45 = vsel %vm676_vm7, %v674_v40, %v661_v34 }
 0x521   : > { %v663_v38 = vpop.permute.xlu1 %662  ;;  %v655_v39 = vpop.permute.xlu0 %654 }
 0x522   : > { %v675_v41 = vsel %vm364_vm3, %v640_v37, %v655_v39 }
 0x523   : > { %v678_v42 = vsel %vm676_vm7, %v675_v41, %v663_v38 }
 0x525   : > { %v671_v43 = vpop.permute.xlu1 %670  ;;  %v669_v44 = vpop.permute.xlu0 %668 }
 0x526   : > { %v681_v46 = vsel %vm679_vm8, %v678_v42, %v671_v43  ;;  %v680_v47 = vsel %vm679_vm8, %v677_v45, %v669_v44 }
 0x527   : > { %967 = vmatprep.mubr.msk.f32.mxu0 %vm693_vm9, %v680_v47 }
 0x528   : > { %968 = vmatmul.mubr.msk.f32.vlgmr.msra.gmra.mrb[0].mxu0 %vm693_vm9, %v681_v46 }
 0x5fb   : > { %v969_v49 = vpop.f32.mrb[0].mxu0 }
 0x5fc   : > { %v772_v50 = vadd.f32 %v969_v49, %v909_v48  ;;  %v766_v51 = vpop.f32.mrb[1].mxu0 }
 0x5fd   : > { %v767_v52 = vadd.f32 %v909_v48, %v766_v51 }
 0x5fe   : > { %776 = vst.msk [vmem:[%s1344_s27 + $0x8] sm:$0xff] %vm693_vm9, %v772_v50 }
 0x5ff   : > { %775 = vst.msk [vmem:[%s1344_s27] sm:$0xff] %vm693_vm9, %v767_v52 }
 0x600 PF: > { %s919_s25 = sshll.u32 %s1193_s20, 8  ;;  %s791_s28 = sshll.u32 %s1344_s27, 4  ;;  %s1411_s28 = int_to_ptr.vmem [resolvable:$true] %s791_s28 }
 0x601   : > { %s1408_s7 = scalar_lea.hbm %s1477_s4, %s919_s25  ;;  %s1415_s29 = scalar_lea.sflag [#allocation10], %s222_s9 }
 0x602   : > { %s1099_s18 = scalar_lea.vmem %s1411_s28, 256  ;;  %s1220_s20 = smov [#allocation9]  }
 0x603   : > { %p1100_p7 = scmp.ne.s32.totalorder %s1411_s28, %s1099_s18  ;;  %s1103_s19 = sshll.u32 %s1220_s20, 4  ;;  %s1104_s19 = int_to_ptr.vmem [resolvable:$false] %s1103_s19 }
 0x604   : > { %s1105_s10 = scalar_lea.vmem %s1104_s19, 512  ;;  %p1106_p11 = scmp.lt.s32.totalorder %s1411_s28, %s1104_s19 }
 0x605   : > { %p1101_p9 = pnand %p1100_p7, %p1310_p6  ;;  %p1107_p12 = scmp.lt.s32.totalorder %s1105_s10, %s1099_s18 }
 0x607   : > { %p1102_p10 = pneg %p1101_p9  ;;  %p1108_p13 = por %p1107_p12, %p1106_p11 }
 0x609   : > { %p1109_p0 = pnand %p1108_p13, %p1102_p10 }
 0x60b   : > { %1112 = shalt.err (!%p1109_p0)
}
 0x60c   : > { %s1113_s27 = scalar_lea.hbm %s1408_s7, 256  ;;  %s1117_s12 = scalar_lea.hbm %s1477_s4, 512 }
 0x60d   : > { %p1114_p1 = scmp.ne.s32.totalorder %s1408_s7, %s1113_s27  ;;  %p1118_p4 = scmp.lt.u32.totalorder %s1408_s7, %s1477_s4 }
 0x60e   : > { %p1119_p5 = scmp.lt.u32.totalorder %s1117_s12, %s1113_s27  ;;  %p1121_p9 = scmp.lt.u32.totalorder %s1113_s27, %s1408_s7 }
 0x60f   : > { %p1115_p2 = pnand %p1114_p1, %p1310_p6 }
 0x610   : > { %p1120_p7 = por %p1119_p5, %p1118_p4 }
 0x611   : > { %p1116_p3 = pneg %p1115_p2 }
 0x612   : > { %p1122_p10 = por %p1121_p9, %p1120_p7 }
 0x614   : > { %p1123_p11 = pnand %p1122_p10, %p1116_p3 }
 0x616   : > { %1126 = shalt.err (!%p1123_p11)
}
 0x617   : > { %s1221_s25 = smov 128   ;;  %s1222_s26 = smov 8  }
 0x618   : > { %986 = dma.vmem_to_hbm [thread:$0]  (%p1310_p6), %s1411_s28, 256, %s1408_s7, %s1415_s29, %s1221_s25, %s1221_s25, %s1222_s26  }
 0x619 PF: > { %p992_p12 = scmp.ge.s32.totalorder %s1209_s24, 2  ;;  %s806_s6 = sand.u32 1, %s1173_s15  }
 0x61a   : > { %s807_s18 = scalar_lea.sflag [#allocation10], %s806_s6 }
 0x61b   : > { %p989_p13 = pnand %p992_p12, %p1318_p8 }
 0x61d   : > { %1168 = dma.done.wait (!%p989_p13), %s807_s18, 256  }
 0x61e   : > { %1170 = vsyncadd (!%p989_p13), %s807_s18, 4294967040  ;;  %s17_s24 = sadd.s32 1, %s1209_s24   ;;  %s1484_s30 = sld [smem:[#allocation12_spill]] }
 0x61f   : > { %p14_p0 = scmp.ge.s32.totalorder %s17_s24, 18   ;;  %s1485_s7 = sld [smem:[#allocation13_spill]] }
 0x620   : > { %s1486_s28 = sld [smem:[#allocation14_spill]]  ;;  %s1487_s15 = smov %s1177_s16 }
 0x621   : > { %s1488_s16 = smov %s1181_s17  ;;  %s1489_s17 = smov %s1329_s8 }
 0x622   : > { %s1490_s18 = smov %s1197_s21  ;;  %s1491_s19 = smov %s1201_s22 }
 0x623   : > { %s1492_s20 = smov %s1205_s23  ;;  %16 = sbr.rel (!%p14_p0) target bundleno = 6 (0x6), region = 92 }
 0x624   : > { %s1493_s21 = smov %s1484_s30 }
 0x625   : > { %s1494_s22 = smov %s1485_s7 }
 0x626   : > { %s1495_s23 = smov %s1486_s28 }
 0x62a   :  { %812 = vsyncpa [#allocation10], 1 }
 0x62b   :  { %814 = vsyncpa [#allocation10 + $0x1], 1 }

</bundles_post_ra>
